<compile_context>
chip_gen: v5e
topology: v5e:2x2
jax: 0.10.0
libtpu: 0.0.40
codegen_flags: <defaults>
</compile_context>

<pallas_src>
import jax
import jax.numpy as jnp
from jax.experimental import pallas as pl
from jax.experimental.pallas import tpu as pltpu


def dilated_circ_conv_pallas(x, weight, bias, n_adj=4, dilation=1):
    """x: (B, C, N); weight: (O, C, K) with K = 2*n_adj+1; bias: (O,).

    Returns (B, O, N), matching DilatedCircConv.forward (circular pad of
    n_adj*dilation elements on each end, then Conv1d with the given dilation).
    """
    B, C, N = x.shape
    O, Cw, K = weight.shape
    assert Cw == C and K == 2 * n_adj + 1
    pad = n_adj * dilation
    # Same single-wrap limitation as the torch module (torch.cat pad).
    assert pad <= N, "circular pad assumes n_adj * dilation <= N"
    Np = N + 2 * pad

    # Tiny one-off weight relayout: (O, C, K) -> (K, O, C) so each tap k is a
    # contiguous (O, C) matmul LHS.  Cast to x.dtype so bf16 inputs run the
    # MXU at the bf16 rate; the accumulator stays f32 (preferred_element_type).
    w_stack = jnp.transpose(weight, (2, 0, 1)).astype(x.dtype)   # (K, O, C)
    b_col = bias.reshape(O, 1)                                   # (O, 1)

    def kernel(x_ref, w_ref, b_ref, o_ref, xpad_ref):
        # x_ref: (C, N)   w_ref: (K, O, C)   b_ref: (O, 1)   o_ref: (O, N)
        # xpad_ref: VMEM (C, N + 2*pad) scratch, dtype = x.dtype
        x_blk = x_ref[...]
        if pad > 0:
            # Circular pad built once per batch row block (3 small stores),
            # instead of K x (two misaligned stores) into an im2col slab.
            xpad_ref[:, pad:pad + N] = x_blk
            xpad_ref[:, :pad] = x_blk[:, N - pad:]
            xpad_ref[:, pad + N:] = x_blk[:, :pad]
            xp = xpad_ref[...]
        else:
            xp = x_blk

        # K accumulating MXU matmuls; acc lives in vregs (f32) and is written
        # to the output with a single dense store.
        acc = jnp.zeros((O, N), jnp.float32)
        for k in range(K):            # static unroll: K is small and the
            lo = k * dilation         # tap slice offsets must be static.
            acc = acc + jnp.dot(w_ref[k], xp[:, lo:lo + N],
                                preferred_element_type=jnp.float32)
        acc = acc + b_ref[...].astype(jnp.float32)
        o_ref[...] = acc.astype(o_ref.dtype)

    grid_spec = pltpu.PrefetchScalarGridSpec(
        num_scalar_prefetch=0,
        grid=(B,),
        in_specs=[
            pl.BlockSpec((None, C, N), lambda b: (b, 0, 0)),   # per-batch x
            pl.BlockSpec((K, O, C), lambda b: (0, 0, 0)),      # resident W
            pl.BlockSpec((O, 1), lambda b: (0, 0)),            # resident bias
        ],
        out_specs=pl.BlockSpec((None, O, N), lambda b: (b, 0, 0)),
        scratch_shapes=[pltpu.VMEM((C, Np), x.dtype)],
    )

    # TODO(synk): for long sequences, add a second ("parallel") grid axis over
    # N tiles (multiples of 128 lanes, with an n_adj*dilation halo handled via
    # the padded scratch) and budget the per-step working set against v7x's
    # 64 MiB physical VMEM rather than v5e/v6e's 128 MiB.
    return pl.pallas_call(
        kernel,
        out_shape=jax.ShapeDtypeStruct((B, O, N), x.dtype),
        grid_spec=grid_spec,
        compiler_params=pltpu.CompilerParams(
            dimension_semantics=("parallel",),
            vmem_limit_bytes=32 * 1024 * 1024,
        ),
    )(x, w_stack, b_col)


def dilated_circ_conv_ref(x, weight, bias, n_adj=4, dilation=1):
    """Pure-JAX reference (mirrors the PyTorch forward exactly)."""
    pad = n_adj * dilation
    if n_adj != 0:
        x = jnp.concatenate([x[..., -pad:], x, x[..., :pad]], axis=-1)
    out = jax.lax.conv_general_dilated(
        x, weight, window_strides=(1,), padding="VALID",
        rhs_dilation=(dilation,),
        dimension_numbers=("NCH", "OIH", "NCH"))
    return out + bias[None, :, None]


if __name__ == "__main__":
    # Module config (synthetic, deterministic init — no checkpoint load).
    state_dim = 4          # in channels
    out_state_dim = 4      # out channels (defaults to state_dim in the module)
    n_adj = 4
    K = 2 * n_adj + 1      # Conv1d kernel_size = 9
    B, N = 2, 16           # batch, polygon points (sequence length)

    key = jax.random.PRNGKey(0)
    kx, kw, kb = jax.random.split(key, 3)

    bound = 1.0 / (state_dim * K) ** 0.5
    weight = jax.random.uniform(kw, (out_state_dim, state_dim, K),
                                jnp.float32, -bound, bound)
    bias = jax.random.uniform(kb, (out_state_dim,), jnp.float32, -bound, bound)
    x = jax.random.normal(kx, (B, state_dim, N), jnp.float32)

    # dilation=1 (module default)
    out = jax.block_until_ready(
        dilated_circ_conv_pallas(x, weight, bias, n_adj=n_adj, dilation=1))
    ref = dilated_circ_conv_ref(x, weight, bias, n_adj=n_adj, dilation=1)
    assert out.shape == (B, out_state_dim, N)
    assert jnp.allclose(out, ref, rtol=1e-5, atol=1e-5), (
        f"max err {jnp.max(jnp.abs(out - ref))}")

    # dilation=2 path of the module (pad = n_adj*dilation = 8 <= N)
    out2 = jax.block_until_ready(
        dilated_circ_conv_pallas(x, weight, bias, n_adj=n_adj, dilation=2))
    ref2 = dilated_circ_conv_ref(x, weight, bias, n_adj=n_adj, dilation=2)
    assert jnp.allclose(out2, ref2, rtol=1e-5, atol=1e-5), (
        f"max err {jnp.max(jnp.abs(out2 - ref2))}")

    print("KERNEL_OK")
</pallas_src>

<mosaic_0001>
module attributes {stable_mosaic.version = 11 : i64} {
  func.func @kernel(%arg0: i32, %arg1: memref<1x4x16xf32, #tpu.memory_space<vmem>>, %arg2: memref<9x4x4xf32, #tpu.memory_space<vmem>>, %arg3: memref<4x1xf32, #tpu.memory_space<vmem>>, %arg4: memref<1x4x16xf32, #tpu.memory_space<vmem>>, %arg5: memref<4x24xf32, #tpu.memory_space<vmem>>) attributes {dimension_semantics = [#tpu.dimension_semantics<parallel>], iteration_bounds = array<i64: 2>, scalar_prefetch = 0 : i64, scratch_operands = 1 : i64, tpu.core_type = #tpu.core_type<tc>, window_params = [{transform_indices = @transform_0, window_bounds = array<i64: 1, 4, 16>}, {pipeline_mode = #tpu.pipeline_mode<synchronous>, transform_indices = @transform_1, window_bounds = array<i64: 9, 4, 4>}, {pipeline_mode = #tpu.pipeline_mode<synchronous>, transform_indices = @transform_2, window_bounds = array<i64: 4, 1>}, {transform_indices = @transform_3, window_bounds = array<i64: 1, 4, 16>}]} {
    %c0 = arith.constant 0 : index
    %c0_0 = arith.constant 0 : index
    %c0_1 = arith.constant 0 : index
    %0 = vector.load %arg1[%c0, %c0_0, %c0_1] : memref<1x4x16xf32, #tpu.memory_space<vmem>>, vector<1x4x16xf32>
    %1 = vector.shape_cast %0 : vector<1x4x16xf32> to vector<4x16xf32>
    %c0_2 = arith.constant 0 : index
    %c4 = arith.constant 4 : index
    %2 = vector.load %arg5[%c0_2, %c4] : memref<4x24xf32, #tpu.memory_space<vmem>>, vector<4x16xf32>
    tpu.vector_store %arg5[%c0_2, %c4], %1 {strides = array<i32>} : memref<4x24xf32, #tpu.memory_space<vmem>>, vector<4x16xf32>,
    %3 = vector.extract_strided_slice %1 {offsets = [0, 12], sizes = [4, 4], strides = [1, 1]} : vector<4x16xf32> to vector<4x4xf32>
    %c0_3 = arith.constant 0 : index
    %c0_4 = arith.constant 0 : index
    %4 = vector.load %arg5[%c0_3, %c0_4] : memref<4x24xf32, #tpu.memory_space<vmem>>, vector<4x4xf32>
    tpu.vector_store %arg5[%c0_3, %c0_4], %3 {strides = array<i32>} : memref<4x24xf32, #tpu.memory_space<vmem>>, vector<4x4xf32>,
    %5 = vector.extract_strided_slice %1 {offsets = [0, 0], sizes = [4, 4], strides = [1, 1]} : vector<4x16xf32> to vector<4x4xf32>
    %c0_5 = arith.constant 0 : index
    %c20 = arith.constant 20 : index
    %6 = vector.load %arg5[%c0_5, %c20] : memref<4x24xf32, #tpu.memory_space<vmem>>, vector<4x4xf32>
    tpu.vector_store %arg5[%c0_5, %c20], %5 {strides = array<i32>} : memref<4x24xf32, #tpu.memory_space<vmem>>, vector<4x4xf32>,
    %c0_6 = arith.constant 0 : index
    %c0_7 = arith.constant 0 : index
    %7 = vector.load %arg5[%c0_6, %c0_7] : memref<4x24xf32, #tpu.memory_space<vmem>>, vector<4x24xf32>
    %cst = arith.constant 0.000000e+00 : f32
    %8 = vector.broadcast %cst : f32 to vector<4x16xf32>
    %c0_8 = arith.constant 0 : index
    %c0_9 = arith.constant 0 : index
    %c0_10 = arith.constant 0 : index
    %9 = vector.load %arg2[%c0_8, %c0_9, %c0_10] : memref<9x4x4xf32, #tpu.memory_space<vmem>>, vector<1x4x4xf32>
    %10 = vector.shape_cast %9 : vector<1x4x4xf32> to vector<4x4xf32>
    %11 = vector.extract_strided_slice %7 {offsets = [0, 0], sizes = [4, 16], strides = [1, 1]} : vector<4x24xf32> to vector<4x16xf32>
    %cst_11 = arith.constant dense<0.000000e+00> : vector<4x16xf32>
    %12 = tpu.matmul %10, %11, %cst_11 {dimension_numbers = #tpu.dot_dimension_numbers<[1], [0], [0], [1], [0, 0, 1, 1], [], []>} : vector<4x4xf32>, vector<4x16xf32>, vector<4x16xf32> -> vector<4x16xf32>
    %13 = arith.addf %8, %12 : vector<4x16xf32>
    %c1 = arith.constant 1 : index
    %c0_12 = arith.constant 0 : index
    %c0_13 = arith.constant 0 : index
    %14 = vector.load %arg2[%c1, %c0_12, %c0_13] : memref<9x4x4xf32, #tpu.memory_space<vmem>>, vector<1x4x4xf32>
    %15 = vector.shape_cast %14 : vector<1x4x4xf32> to vector<4x4xf32>
    %16 = vector.extract_strided_slice %7 {offsets = [0, 1], sizes = [4, 16], strides = [1, 1]} : vector<4x24xf32> to vector<4x16xf32>
    %cst_14 = arith.constant dense<0.000000e+00> : vector<4x16xf32>
    %17 = tpu.matmul %15, %16, %cst_14 {dimension_numbers = #tpu.dot_dimension_numbers<[1], [0], [0], [1], [0, 0, 1, 1], [], []>} : vector<4x4xf32>, vector<4x16xf32>, vector<4x16xf32> -> vector<4x16xf32>
    %18 = arith.addf %13, %17 : vector<4x16xf32>
    %c2 = arith.constant 2 : index
    %c0_15 = arith.constant 0 : index
    %c0_16 = arith.constant 0 : index
    %19 = vector.load %arg2[%c2, %c0_15, %c0_16] : memref<9x4x4xf32, #tpu.memory_space<vmem>>, vector<1x4x4xf32>
    %20 = vector.shape_cast %19 : vector<1x4x4xf32> to vector<4x4xf32>
    %21 = vector.extract_strided_slice %7 {offsets = [0, 2], sizes = [4, 16], strides = [1, 1]} : vector<4x24xf32> to vector<4x16xf32>
    %cst_17 = arith.constant dense<0.000000e+00> : vector<4x16xf32>
    %22 = tpu.matmul %20, %21, %cst_17 {dimension_numbers = #tpu.dot_dimension_numbers<[1], [0], [0], [1], [0, 0, 1, 1], [], []>} : vector<4x4xf32>, vector<4x16xf32>, vector<4x16xf32> -> vector<4x16xf32>
    %23 = arith.addf %18, %22 : vector<4x16xf32>
    %c3 = arith.constant 3 : index
    %c0_18 = arith.constant 0 : index
    %c0_19 = arith.constant 0 : index
    %24 = vector.load %arg2[%c3, %c0_18, %c0_19] : memref<9x4x4xf32, #tpu.memory_space<vmem>>, vector<1x4x4xf32>
    %25 = vector.shape_cast %24 : vector<1x4x4xf32> to vector<4x4xf32>
    %26 = vector.extract_strided_slice %7 {offsets = [0, 3], sizes = [4, 16], strides = [1, 1]} : vector<4x24xf32> to vector<4x16xf32>
    %cst_20 = arith.constant dense<0.000000e+00> : vector<4x16xf32>
    %27 = tpu.matmul %25, %26, %cst_20 {dimension_numbers = #tpu.dot_dimension_numbers<[1], [0], [0], [1], [0, 0, 1, 1], [], []>} : vector<4x4xf32>, vector<4x16xf32>, vector<4x16xf32> -> vector<4x16xf32>
    %28 = arith.addf %23, %27 : vector<4x16xf32>
    %c4_21 = arith.constant 4 : index
    %c0_22 = arith.constant 0 : index
    %c0_23 = arith.constant 0 : index
    %29 = vector.load %arg2[%c4_21, %c0_22, %c0_23] : memref<9x4x4xf32, #tpu.memory_space<vmem>>, vector<1x4x4xf32>
    %30 = vector.shape_cast %29 : vector<1x4x4xf32> to vector<4x4xf32>
    %31 = vector.extract_strided_slice %7 {offsets = [0, 4], sizes = [4, 16], strides = [1, 1]} : vector<4x24xf32> to vector<4x16xf32>
    %cst_24 = arith.constant dense<0.000000e+00> : vector<4x16xf32>
    %32 = tpu.matmul %30, %31, %cst_24 {dimension_numbers = #tpu.dot_dimension_numbers<[1], [0], [0], [1], [0, 0, 1, 1], [], []>} : vector<4x4xf32>, vector<4x16xf32>, vector<4x16xf32> -> vector<4x16xf32>
    %33 = arith.addf %28, %32 : vector<4x16xf32>
    %c5 = arith.constant 5 : index
    %c0_25 = arith.constant 0 : index
    %c0_26 = arith.constant 0 : index
    %34 = vector.load %arg2[%c5, %c0_25, %c0_26] : memref<9x4x4xf32, #tpu.memory_space<vmem>>, vector<1x4x4xf32>
    %35 = vector.shape_cast %34 : vector<1x4x4xf32> to vector<4x4xf32>
    %36 = vector.extract_strided_slice %7 {offsets = [0, 5], sizes = [4, 16], strides = [1, 1]} : vector<4x24xf32> to vector<4x16xf32>
    %cst_27 = arith.constant dense<0.000000e+00> : vector<4x16xf32>
    %37 = tpu.matmul %35, %36, %cst_27 {dimension_numbers = #tpu.dot_dimension_numbers<[1], [0], [0], [1], [0, 0, 1, 1], [], []>} : vector<4x4xf32>, vector<4x16xf32>, vector<4x16xf32> -> vector<4x16xf32>
    %38 = arith.addf %33, %37 : vector<4x16xf32>
    %c6 = arith.constant 6 : index
    %c0_28 = arith.constant 0 : index
    %c0_29 = arith.constant 0 : index
    %39 = vector.load %arg2[%c6, %c0_28, %c0_29] : memref<9x4x4xf32, #tpu.memory_space<vmem>>, vector<1x4x4xf32>
    %40 = vector.shape_cast %39 : vector<1x4x4xf32> to vector<4x4xf32>
    %41 = vector.extract_strided_slice %7 {offsets = [0, 6], sizes = [4, 16], strides = [1, 1]} : vector<4x24xf32> to vector<4x16xf32>
    %cst_30 = arith.constant dense<0.000000e+00> : vector<4x16xf32>
    %42 = tpu.matmul %40, %41, %cst_30 {dimension_numbers = #tpu.dot_dimension_numbers<[1], [0], [0], [1], [0, 0, 1, 1], [], []>} : vector<4x4xf32>, vector<4x16xf32>, vector<4x16xf32> -> vector<4x16xf32>
    %43 = arith.addf %38, %42 : vector<4x16xf32>
    %c7 = arith.constant 7 : index
    %c0_31 = arith.constant 0 : index
    %c0_32 = arith.constant 0 : index
    %44 = vector.load %arg2[%c7, %c0_31, %c0_32] : memref<9x4x4xf32, #tpu.memory_space<vmem>>, vector<1x4x4xf32>
    %45 = vector.shape_cast %44 : vector<1x4x4xf32> to vector<4x4xf32>
    %46 = vector.extract_strided_slice %7 {offsets = [0, 7], sizes = [4, 16], strides = [1, 1]} : vector<4x24xf32> to vector<4x16xf32>
    %cst_33 = arith.constant dense<0.000000e+00> : vector<4x16xf32>
    %47 = tpu.matmul %45, %46, %cst_33 {dimension_numbers = #tpu.dot_dimension_numbers<[1], [0], [0], [1], [0, 0, 1, 1], [], []>} : vector<4x4xf32>, vector<4x16xf32>, vector<4x16xf32> -> vector<4x16xf32>
    %48 = arith.addf %43, %47 : vector<4x16xf32>
    %c8 = arith.constant 8 : index
    %c0_34 = arith.constant 0 : index
    %c0_35 = arith.constant 0 : index
    %49 = vector.load %arg2[%c8, %c0_34, %c0_35] : memref<9x4x4xf32, #tpu.memory_space<vmem>>, vector<1x4x4xf32>
    %50 = vector.shape_cast %49 : vector<1x4x4xf32> to vector<4x4xf32>
    %51 = vector.extract_strided_slice %7 {offsets = [0, 8], sizes = [4, 16], strides = [1, 1]} : vector<4x24xf32> to vector<4x16xf32>
    %cst_36 = arith.constant dense<0.000000e+00> : vector<4x16xf32>
    %52 = tpu.matmul %50, %51, %cst_36 {dimension_numbers = #tpu.dot_dimension_numbers<[1], [0], [0], [1], [0, 0, 1, 1], [], []>} : vector<4x4xf32>, vector<4x16xf32>, vector<4x16xf32> -> vector<4x16xf32>
    %53 = arith.addf %48, %52 : vector<4x16xf32>
    %c0_37 = arith.constant 0 : index
    %c0_38 = arith.constant 0 : index
    %54 = vector.load %arg3[%c0_37, %c0_38] : memref<4x1xf32, #tpu.memory_space<vmem>>, vector<4x1xf32>
    %55 = vector.broadcast %54 : vector<4x1xf32> to vector<4x16xf32>
    %56 = arith.addf %53, %55 : vector<4x16xf32>
    %c0_39 = arith.constant 0 : index
    %c0_40 = arith.constant 0 : index
    %c0_41 = arith.constant 0 : index
    %57 = vector.load %arg4[%c0_39, %c0_40, %c0_41] : memref<1x4x16xf32, #tpu.memory_space<vmem>>, vector<1x4x16xf32>
    %58 = vector.shape_cast %57 : vector<1x4x16xf32> to vector<4x16xf32>
    %59 = vector.shape_cast %56 : vector<4x16xf32> to vector<1x4x16xf32>
    tpu.vector_store %arg4[%c0_39, %c0_40, %c0_41], %59 {strides = array<i32>} : memref<1x4x16xf32, #tpu.memory_space<vmem>>, vector<1x4x16xf32>,
    return
  }
  func.func @transform_0(%arg0: i32) -> (i32, i32, i32) {
    %c0_i32 = arith.constant 0 : i32
    %c0_i32_0 = arith.constant 0 : i32
    %c0_i32_1 = arith.constant 0 : i32
    return %arg0, %c0_i32, %c0_i32_0 : i32, i32, i32
  }
  func.func @transform_1(%arg0: i32) -> (i32, i32, i32) {
    %c0_i32 = arith.constant 0 : i32
    %c0_i32_0 = arith.constant 0 : i32
    %c0_i32_1 = arith.constant 0 : i32
    %c0_i32_2 = arith.constant 0 : i32
    return %c0_i32, %c0_i32_0, %c0_i32_1 : i32, i32, i32
  }
  func.func @transform_2(%arg0: i32) -> (i32, i32) {
    %c0_i32 = arith.constant 0 : i32
    %c0_i32_0 = arith.constant 0 : i32
    %c0_i32_1 = arith.constant 0 : i32
    return %c0_i32, %c0_i32_0 : i32, i32
  }
  func.func @transform_3(%arg0: i32) -> (i32, i32, i32) {
    %c0_i32 = arith.constant 0 : i32
    %c0_i32_0 = arith.constant 0 : i32
    %c0_i32_1 = arith.constant 0 : i32
    return %arg0, %c0_i32, %c0_i32_0 : i32, i32, i32
  }
}

</mosaic_0001>

<bundles_post_ra>
// kernel: tpu_custom_call.1
= control target key start
LH: loop header
LB: loop body
LE: loop exit
PB: predicated region body
PF: predicated region fallthrough
CT: control target
= control target key end

     0   :  { %8 = vsyncpa [#allocation4], 0  ;;  %s854_s0 = inlined_call_operand.vmem [shape: f32[2,4,16], index: 0, kind: input, shape index: {}]   ;;  %s855_s1 = inlined_call_operand.vmem [shape: f32[9,4,4], index: 1, kind: input, shape index: {}]   ;;  %s856_s2 = inlined_call_operand.vmem [shape: f32[4,1], index: 2, kind: input, shape index: {}]   ;;  %s857_s3 = inlined_call_operand.hbm [shape: f32[2,4,16], index: 3, kind: output, shape index: {}]  }
   0x1   :  { %10 = vsyncpa [#allocation4 + $0x1], 0  ;;  %s721_s12 = smov 0   ;;  %s723_s13 = smov 0  }
   0x2   :  { %s725_s14 = smov 0   ;;  %s727_s15 = smov 0  }
   0x3 LB: > { %s742_s16 = sadd.s32 4294967295, %s687_s15   ;;  %s536_s17 = sadd.s32 4294967294, %s687_s15   ;;  %s687_s15 = sphi %s727_s15, %s863_s15   ;;  %s683_s14 = sphi %s725_s14, %s862_s14   ;;  %s679_s13 = sphi %s723_s13, %s861_s13   ;;  %s675_s12 = sphi %s721_s12, %s860_s12  }
   0x4   : > { %s746_s18 = sadd.s32 1, %s687_s15   ;;  %s91_s19 = sadd.s32 1, %s683_s14 }
   0x5   : > { %s88_s20 = ssub.s32 %s687_s15, %s746_s18  ;;  %p101_p0 = scmp.ne.s32.totalorder %s683_s14, %s679_s13 }
   0x6   : > { %p89_p1 = scmp.eq.s32.totalorder %s88_s20, 0  ;;  %p102_p2 = scmp.eq.s32.totalorder %s742_s16, 1 }
   0x7   : > { %p107_p3 = scmp.ne.s32.totalorder %s679_s13, %s675_s12  ;;  %p108_p4 = scmp.eq.s32.totalorder %s536_s17, 1 }
   0x8   : > { %s757_s21 = scalar_select %p89_p1, %s683_s14, %s91_s19  }
   0x9   : > { %p759_p5 = por %p102_p2, %p101_p0  ;;  %p763_p6 = por %p108_p4, %p107_p3 }
   0xa   : > { %p539_p7 = scmp.ge.s32.totalorder %s687_s15, 1  ;;  %p139_p8 = scmp.lt.s32.totalorder %s687_s15, 3 }
   0xc   : > { %p140_p9 = pnand %p539_p7, %p139_p8 }
   0xd   : > { %p162_p10 = scmp.lt.s32.totalorder (!%p140_p9), %s742_s16, 1  ;;  %s689_s29 = smov (!%p140_p9), 4  }
   0xe   : > { %143 = sbr.rel (%p140_p9) target bundleno = 424 (0x1a8), region = 32  ;;  %s690_s30 = smov (!%p140_p9), 20  }
   0xf   : > { %s691_s4 = smov (!%p140_p9), 116   ;;  %s692_s5 = smov (!%p140_p9), 122  }
  0x10   : > { %s693_s6 = smov (!%p140_p9), 127   ;;  %s694_s7 = smov (!%p140_p9), 126  }
  0x11   : > { %s695_s8 = smov (!%p140_p9), 123   ;;  %s696_s9 = smov (!%p140_p9), 125  }
  0x12   : > { %s697_s10 = smov (!%p140_p9), 124   ;;  %s698_s11 = smov (!%p140_p9), 121  }
  0x13   : > { %s163_s24 = scalar_select %p162_p10, %s742_s16, 1  ;;  %vm171_vm0 = vcmask 158752   ;;  %vm176_vm1 = vcmask 27648   ;;  %vm181_vm2 = vcmask 191648   ;;  %vm194_vm3 = vcmask 1043456  }
  0x14   : > { %s699_s17 = smov 120   ;;  %vm190_vm4 = vcmask 31744   ;;  %v184_v5 = vld [vmem:[%s855_s1] sm:$0xf]  ;;  %v542_v6 = vld [vmem:[%s855_s1 + $0x4] sm:$0xf] }
  0x15   : > { %s541_s25 = sshll.u32 %s163_s24, 2  ;;  %v550_v8 = vld [vmem:[%s855_s1 + $0xc] sm:$0xf]  ;;  %v452_v10 = vld [vmem:[%s856_s2] sm:$0xf]  ;;  %v700_v11 = vmov 0  }
  0x16   : > { %s165_s28 = scalar_lea.vmem %s854_s0, %s541_s25  ;;  %623 = vset.pattern.permute.xlu2 %v700_v11  ;;  %624 = vset.pattern.permute.xlu0 %v700_v11  ;;  %v562_v12 = vld [vmem:[%s855_s1 + $0x1c] sm:$0xf]  ;;  %v547_v16 = vld [vmem:[%s855_s1 + $0x8] sm:$0xf]  ;;  %v556_v17 = vld [vmem:[%s855_s1 + $0x14] sm:$0xf] }
  0x17   : > { %v166_v0 = vld [vmem:[%s165_s28] sm:$0xf]  ;;  %v553_v19 = vld [vmem:[%s855_s1 + $0x10] sm:$0xf]  ;;  %v559_v21 = vld [vmem:[%s855_s1 + $0x18] sm:$0xf] }
  0x18   : > { %168 = vrot.lane.b32.xlu0 %v166_v0, %s689_s29  ;;  %178 = vrot.lane.b32.xlu1 %v166_v0, %s690_s30  ;;  %v565_v22 = vld [vmem:[%s855_s1 + $0x20] sm:$0xf]  ;;  %s159_s24 = sand.u32 1, %s679_s13   ;;  %s569_s26 = sshll.u32 %s742_s16, 2  ;;  %vm459_vm5 = vcmask 125952  }
  0x19   : > { %s540_s25 = sshll.u32 %s159_s24, 2  ;;  %s472_s29 = scalar_lea.hbm %s857_s3, %s569_s26 }
  0x1a   : > { %s161_s30 = scalar_lea.vmem [#allocation3], %s540_s25  ;;  %s462_s16 = scalar_lea.sflag [#allocation4], %s159_s24 }
  0x20   : > { %173 = vrot.lane.b32.xlu0 %v166_v0, %s691_s4  ;;  %s474_s4 = sshll.u32 %s161_s30, 4  ;;  %s475_s4 = int_to_ptr.vmem [resolvable:$true] %s474_s4 }
  0x8a   : > { %v169_v1 = vpop.permute.xlu0 %168  ;;  %v179_v2 = vpop.permute.xlu1 %178 }
  0x8b   : > { %172 = vst.msk [vmem:[#allocation2] sm:$0xf] %vm171_vm0, %v169_v1 }
  0x92   : > { %v174_v3 = vpop.permute.xlu0 %173 }
  0x93   : > { %177 = vst.msk [vmem:[#allocation2] sm:$0xf] %vm176_vm1, %v174_v3 }
  0x94   : > { %182 = vst.msk [vmem:[#allocation2] sm:$0xf] %vm181_vm2, %v179_v2 }
  0x9b   : > { %v183_v4 = vld [vmem:[#allocation2] sm:$0xf] }
  0x9c   : > { %364 = vrot.lane.b32.xlu0 %v183_v4, %s692_s5  ;;  %188 = vrot.lane.b32.xlu2 %v183_v4, %s693_s6  ;;  %s476_s5 = sshll.u32 %s472_s29, 4  ;;  %s477_s5 = int_to_ptr.hbm [resolvable:$true] %s476_s5 }
  0x9d   : > { %244 = vrot.lane.b32.xlu1 %v183_v4, %s694_s7  ;;  %545 = vmatpush.msk.msra.mxu1 %vm194_vm3, %v183_v4  ;;  %s639_s6 = sshra.s32 %s477_s5, 4  ;;  %s640_s6 = int_to_ptr.hbm [resolvable:$true] %s639_s6 }
  0x9e   : > { %546 = vmatmul.msk.f32.vlgmr.msra.gmra.mxu1 %vm190_vm4, %v184_v5  ;;  %s641_s7 = scalar_lea.hbm %s640_s6, 4  ;;  %p646_p0 = scmp.lt.s32.totalorder %s640_s6, %s857_s3 }
  0x9f   : > { %p642_p11 = scmp.ne.s32.totalorder %s640_s6, %s641_s7 }
  0xa1   : > { %p643_p12 = pnand %p642_p11, %p759_p5 }
  0xa3   : > { %p644_p13 = pneg %p643_p12 }
  0xa4   : > { %334 = vrot.lane.b32.xlu0 %v183_v4, %s695_s8  ;;  %274 = vrot.lane.b32.xlu2 %v183_v4, %s696_s9 }
  0xa5   : > { %304 = vrot.lane.b32.xlu1 %v183_v4, %s697_s10  ;;  %s645_s10 = scalar_lea.hbm %s857_s3, 8 }
  0xa6   : > { %p647_p1 = scmp.lt.s32.totalorder %s645_s10, %s641_s7 }
  0xa8   : > { %p648_p2 = por %p647_p1, %p646_p0 }
  0xaa   : > { %p649_p3 = pnand %p648_p2, %p644_p13 }
  0xac   : > { %394 = vrot.lane.b32.xlu2 %v183_v4, %s698_s11 }
  0xad   : > { %424 = vrot.lane.b32.xlu1 %v183_v4, %s699_s17 }
  0xb4   : > { %455 = vperm.xlu2 %623, %v452_v10  }
  0xf6   : > { %v189_v7 = vpop.permute.xlu2 %188 }
  0xf7   : > { %543 = vmatpush.msk.msra.mxu0 %vm194_vm3, %v189_v7 }
  0xf8   : > { %544 = vmatmul.msk.f32.vlgmr.msra.gmra.mxu0 %vm190_vm4, %v542_v6 }
  0xfe   : > { %v275_v9 = vpop.permute.xlu2 %274 }
  0xff   : > { %551 = vmatpush.msk.msra.mxu3 %vm194_vm3, %v275_v9 }
 0x100   : > { %552 = vmatmul.msk.f32.vlgmr.msra.gmra.mxu3 %vm190_vm4, %v550_v8 }
 0x106   : > { %v395_v13 = vpop.permute.xlu2 %394 }
 0x107   : > { %563 = vmatpush.msk.msrb.mxu3 %vm194_vm3, %v395_v13 }
 0x108   : > { %564 = vmatmul.msk.f32.vlgmr.msrb.gmra.mxu3 %vm190_vm4, %v562_v12 }
 0x10e   : > { %v365_v14 = vpop.permute.xlu0 %364  ;;  %v456_v40 = vpop.permute.xlu2 %455 }
 0x10f   : > { %v245_v15 = vpop.permute.xlu1 %244 }
 0x110   : > { %548 = vmatpush.msk.msra.mxu2 %vm194_vm3, %v245_v15 }
 0x111   : > { %549 = vmatmul.msk.f32.vlgmr.msra.gmra.mxu2 %vm190_vm4, %v547_v16 }
 0x112   : > { %560 = vmatpush.msk.msrb.mxu2 %vm194_vm3, %v365_v14 }
 0x116   : > { %v335_v18 = vpop.permute.xlu0 %334 }
 0x117   : > { %v305_v20 = vpop.permute.xlu1 %304  ;;  %557 = vmatpush.msk.msrb.mxu1 %vm194_vm3, %v335_v18 }
 0x118   : > { %554 = vmatpush.msk.msrb.mxu0 %vm194_vm3, %v305_v20  ;;  %558 = vmatmul.msk.f32.vlgmr.msrb.gmra.mxu1 %vm190_vm4, %v556_v17 }
 0x119   : > { %555 = vmatmul.msk.f32.vlgmr.msrb.gmra.mxu0 %vm190_vm4, %v553_v19  ;;  %561 = vmatmul.msk.f32.vlgmr.msrb.gmra.mxu2 %vm190_vm4, %v559_v21 }
 0x11b   : > { %v239_v25 = vpop.f32.mrf.mxu1 }
 0x11f   : > { %v425_v23 = vpop.permute.xlu1 %424 }
 0x120   : > { %566 = vmatpush.msk.msra.mxu0 %vm194_vm3, %v425_v23 }
 0x121   : > { %567 = vmatmul.msk.f32.vlgmr.msra.gmra.mxu0 %vm190_vm4, %v565_v22 }
 0x175   : > { %v214_v24 = vpop.f32.mrf.mxu0 }
 0x176   : > { %v240_v27 = vadd.f32 %v239_v25, %v214_v24 }
 0x183   : > { %v298_v26 = vpop.f32.mrf.mxu3 }
 0x18b   : > { %v418_v36 = vpop.f32.mrf.mxu3 }
 0x194   : > { %v268_v28 = vpop.f32.mrf.mxu2 }
 0x195   : > { %v271_v29 = vadd.f32 %v268_v28, %v240_v27  ;;  %v358_v32 = vpop.f32.mrf.mxu1 }
 0x196   : > { %v328_v30 = vpop.f32.mrf.mxu0 }
 0x197   : > { %v301_v31 = vadd.f32 %v298_v26, %v271_v29 }
 0x199   : > { %v331_v33 = vadd.f32 %v328_v30, %v301_v31 }
 0x19b   : > { %v361_v34 = vadd.f32 %v358_v32, %v331_v33 }
 0x19c   : > { %v388_v35 = vpop.f32.mrf.mxu2 }
 0x19d   : > { %v391_v37 = vadd.f32 %v388_v35, %v361_v34 }
 0x19e   : > { %v448_v38 = vpop.f32.mrf.mxu0 }
 0x19f   : > { %v421_v39 = vadd.f32 %v418_v36, %v391_v37 }
 0x1a1   : > { %v451_v41 = vadd.f32 %v448_v38, %v421_v39 }
 0x1a3   : > { %v458_v42 = vadd.f32 %v456_v40, %v451_v41 }
 0x1a5   : > { %460 = vst.msk [vmem:[%s161_s30] sm:$0xf] %vm459_vm5, %v458_v42 }
 0x1a6   : > { %652 = shalt.err (!%p649_p3)
}
 0x1a7   : > { %572 = dma.vmem_to_hbm [thread:$0]  (%p759_p5), %s475_s4, 64, %s477_s5, %s462_s16  }
 0x1a8 PF: > { %p578_p4 = scmp.ge.s32.totalorder %s687_s15, 2  ;;  %s488_s19 = sand.u32 1, %s675_s12  }
 0x1a9   : > { %s489_s20 = scalar_lea.sflag [#allocation4], %s488_s19 }
 0x1aa   : > { %p575_p7 = pnand %p578_p4, %p763_p6 }
 0x1ac   : > { %p576_p8 = pneg %p575_p7 }
 0x1ae   : > { %670 = dma.done.wait (%p576_p8), %s489_s20, 64  }
 0x1af   : > { %672 = vsyncadd (%p576_p8), %s489_s20, 4294967232  ;;  %p13_p9 = scmp.ge.s32.totalorder %s746_s18, 4   ;;  %s860_s12 = smov %s679_s13 }
 0x1b0   : > { %s861_s13 = smov %s683_s14  ;;  %s862_s14 = smov %s757_s21 }
 0x1b1   : > { %s863_s15 = smov %s746_s18  ;;  %15 = sbr.rel (!%p13_p9) target bundleno = 3 (0x3), region = 75 }
 0x1b6   :  { %495 = vsyncpa [#allocation4], 1 }
 0x1b7   :  { %497 = vsyncpa [#allocation4 + $0x1], 1 }

</bundles_post_ra>
